<compile_context>
chip_gen: v7x
topology: tpu7x:2x2x1
jax: 0.10.0
libtpu: 0.0.40
codegen_flags: <defaults>
</compile_context>

<pallas_src>
import functools

import jax
import jax.numpy as jnp
from jax.experimental import pallas as pl
from jax.experimental.pallas import tpu as pltpu

_LANE = 128          # lane width: last-dim padding target
_SUBLANE = 8         # sublane width: row-tile divisibility requirement
_TILE_N_MAX = 512    # row tile; sized so 2x double-buffered tiles + resident
                     # weights fit comfortably under every gen's scoped VMEM


def _round_up(x, m):
    return ((x + m - 1) // m) * m


def _classifier_kernel(x_ref, w1_ref, b1_ref, w2_ref, b2_ref, o_ref):
    # hidden = relu(x @ W1 + b1): bf16 MXU matmul, f32 accumulate, f32 epilogue.
    h = jnp.dot(x_ref[...], w1_ref[...], preferred_element_type=jnp.float32)
    h = jnp.maximum(h + b1_ref[...], 0.0)
    # Second head matmul also runs on the MXU in bf16 with f32 accumulation.
    logits = jnp.dot(h.astype(w2_ref.dtype), w2_ref[...],
                     preferred_element_type=jnp.float32)
    o_ref[...] = logits + b2_ref[...]


def _run_classifier_logits(x2d, w1, b1, w2, b2, tile_n):
    """x2d: [N_pad, D_pad] bf16 -> logits [N_pad, C_pad] f32 (lane-dense)."""
    n_pad, d_pad = x2d.shape
    h_pad = w1.shape[1]
    c_pad = w2.shape[1]
    grid = (n_pad // tile_n,)
    return pl.pallas_call(
        _classifier_kernel,
        out_shape=jax.ShapeDtypeStruct((n_pad, c_pad), jnp.float32),
        grid=grid,
        in_specs=[
            pl.BlockSpec((tile_n, d_pad), lambda i: (i, 0)),   # X: tiled rows
            pl.BlockSpec((d_pad, h_pad), lambda i: (0, 0)),    # W1: resident
            pl.BlockSpec((1, h_pad), lambda i: (0, 0)),        # b1: resident
            pl.BlockSpec((h_pad, c_pad), lambda i: (0, 0)),    # W2: resident
            pl.BlockSpec((1, c_pad), lambda i: (0, 0)),        # b2: resident
        ],
        out_specs=pl.BlockSpec((tile_n, c_pad), lambda i: (i, 0)),
        compiler_params=pltpu.CompilerParams(
            dimension_semantics=("parallel",),
            vmem_limit_bytes=32 * 1024 * 1024,
        ),
    )(x2d, w1, b1, w2, b2)


class ClassifierJudgePallas:
    """Judge wrapping a synthetic classifier; forward == classifier.classify(X, frame_level)."""

    def __init__(self, in_dim, hidden_dim, factor_classes, key):
        self.factor_classes = dict(factor_classes)          # {factor_name: num_classes}
        self.in_dim = in_dim
        self.hidden_dim = hidden_dim
        self.c_total = sum(self.factor_classes.values())

        # Lane-dense padded dims (multiples of 128 on the last axis).
        self.d_pad = _round_up(in_dim, _LANE)
        self.h_pad = _round_up(hidden_dim, _LANE)
        self.c_pad = _round_up(self.c_total, _LANE)

        k1, k2 = jax.random.split(key)
        # Deterministic synthetic parameters (stand-in for checkpoint weights).
        w1 = (jax.random.normal(k1, (in_dim, hidden_dim), jnp.float32)
              / jnp.sqrt(jnp.float32(in_dim)))
        w2 = (jax.random.normal(k2, (hidden_dim, self.c_total), jnp.float32)
              / jnp.sqrt(jnp.float32(hidden_dim)))

        # Zero-pad: padded X cols / W1 rows/cols / W2 rows/cols contribute
        # exactly 0, so results over the real dims are unchanged.
        self.w1 = jnp.zeros((self.d_pad, self.h_pad), jnp.bfloat16
                            ).at[:in_dim, :hidden_dim].set(w1.astype(jnp.bfloat16))
        self.b1 = jnp.zeros((1, self.h_pad), jnp.float32)
        self.w2 = jnp.zeros((self.h_pad, self.c_pad), jnp.bfloat16
                            ).at[:hidden_dim, :self.c_total].set(w2.astype(jnp.bfloat16))
        self.b2 = jnp.zeros((1, self.c_pad), jnp.float32)

    @functools.partial(jax.jit, static_argnums=(0,))
    def _logits(self, X):
        B, T, D = X.shape
        N = B * T
        # Row tile: as large as possible (<=512), multiple of the 8-sublane unit.
        if N >= _TILE_N_MAX:
            tile_n = _TILE_N_MAX
        else:
            tile_n = _round_up(N, _SUBLANE)
        n_pad = _round_up(N, tile_n)

        x2d = X.reshape(N, D).astype(jnp.bfloat16)
        x2d = jnp.pad(x2d, ((0, n_pad - N), (0, self.d_pad - D)))

        logits = _run_classifier_logits(
            x2d, self.w1, self.b1, self.w2, self.b2, tile_n)   # [N_pad, C_pad] f32
        # Slice off padded rows and padded (all-zero) logit columns BEFORE any
        # argmax so padding can never win a tie.
        return logits[:N, :self.c_total].reshape(B, T, self.c_total)

    def __call__(self, X, frame_level=False):
        """Return dict of predicted class indices per factor (judge forward pass)."""
        logits = self._logits(X)                          # [B, T, C_total] f32
        # TODO(synk): the per-factor split / mean / argmax stays in JAX glue
        # (tiny class dims); folding the T-mean into the kernel epilogue would
        # further cut writeback by a factor of T for frame_level=False.
        predictions = {}
        off = 0
        for name, n_cls in self.factor_classes.items():
            fl = logits[..., off:off + n_cls]             # [B, T, C_f]
            off += n_cls
            if frame_level:
                predictions[name] = jnp.argmax(fl, axis=-1)          # [B, T]
            else:
                predictions[name] = jnp.argmax(fl.mean(axis=1), -1)  # [B]
        return predictions


if __name__ == "__main__":
    key = jax.random.PRNGKey(0)
    k_x, k_params = jax.random.split(key)

    B, T, D, H = 2, 8, 32, 64
    factor_classes = {"factor_a": 5, "factor_b": 7}

    judge = ClassifierJudgePallas(D, H, factor_classes, k_params)
    X = jax.random.normal(k_x, (B, T, D), jnp.float32)

    seq_preds = judge(X, frame_level=False)
    frame_preds = judge(X, frame_level=True)

    jax.block_until_ready(seq_preds)
    jax.block_until_ready(frame_preds)

    assert set(seq_preds.keys()) == set(factor_classes.keys())
    for name, n_cls in factor_classes.items():
        assert seq_preds[name].shape == (B,)
        assert frame_preds[name].shape == (B, T)
        assert int(jnp.max(seq_preds[name])) < n_cls
        assert int(jnp.max(frame_preds[name])) < n_cls

    # Cross-check against a pure-JAX reference of the same synthetic classifier.
    w1f = judge.w1[:D, :H].astype(jnp.float32)
    w2f = judge.w2[:H, :judge.c_total].astype(jnp.float32)
    hid = jnp.maximum(X.reshape(B * T, D).astype(jnp.bfloat16).astype(jnp.float32) @ w1f, 0.0)
    ref_logits = (hid @ w2f).reshape(B, T, judge.c_total)
    got_logits = judge._logits(X)
    assert jnp.allclose(got_logits, ref_logits, atol=2e-2, rtol=2e-2)

    print("KERNEL_OK")
</pallas_src>

<mosaic_0001>
module attributes {stable_mosaic.version = 11 : i64} {
  func.func @_classifier_kernel(%arg0: i32, %arg1: memref<16x128xbf16, #tpu.memory_space<vmem>>, %arg2: memref<128x128xbf16, #tpu.memory_space<vmem>>, %arg3: memref<1x128xf32, #tpu.memory_space<vmem>>, %arg4: memref<128x128xbf16, #tpu.memory_space<vmem>>, %arg5: memref<1x128xf32, #tpu.memory_space<vmem>>, %arg6: memref<16x128xf32, #tpu.memory_space<vmem>>) attributes {dimension_semantics = [#tpu.dimension_semantics<parallel>], iteration_bounds = array<i64: 1>, scalar_prefetch = 0 : i64, scratch_operands = 0 : i64, tpu.core_type = #tpu.core_type<tc>, window_params = [{transform_indices = @transform_0, window_bounds = array<i64: 16, 128>}, {pipeline_mode = #tpu.pipeline_mode<synchronous>, transform_indices = @transform_1, window_bounds = array<i64: 128, 128>}, {pipeline_mode = #tpu.pipeline_mode<synchronous>, transform_indices = @transform_2, window_bounds = array<i64: 1, 128>}, {pipeline_mode = #tpu.pipeline_mode<synchronous>, transform_indices = @transform_3, window_bounds = array<i64: 128, 128>}, {pipeline_mode = #tpu.pipeline_mode<synchronous>, transform_indices = @transform_4, window_bounds = array<i64: 1, 128>}, {transform_indices = @transform_5, window_bounds = array<i64: 16, 128>}]} {
    %c0 = arith.constant 0 : index
    %c0_0 = arith.constant 0 : index
    %0 = vector.load %arg1[%c0, %c0_0] : memref<16x128xbf16, #tpu.memory_space<vmem>>, vector<16x128xbf16>
    %c0_1 = arith.constant 0 : index
    %c0_2 = arith.constant 0 : index
    %1 = vector.load %arg2[%c0_1, %c0_2] : memref<128x128xbf16, #tpu.memory_space<vmem>>, vector<128x128xbf16>
    %cst = arith.constant dense<0.000000e+00> : vector<16x128xf32>
    %2 = tpu.matmul %0, %1, %cst {dimension_numbers = #tpu.dot_dimension_numbers<[1], [0], [0], [1], [0, 0, 1, 1], [], []>} : vector<16x128xbf16>, vector<128x128xbf16>, vector<16x128xf32> -> vector<16x128xf32>
    %c0_3 = arith.constant 0 : index
    %c0_4 = arith.constant 0 : index
    %3 = vector.load %arg3[%c0_3, %c0_4] : memref<1x128xf32, #tpu.memory_space<vmem>>, vector<1x128xf32>
    %4 = vector.broadcast %3 : vector<1x128xf32> to vector<16x128xf32>
    %5 = arith.addf %2, %4 : vector<16x128xf32>
    %cst_5 = arith.constant 0.000000e+00 : f32
    %6 = vector.broadcast %cst_5 : f32 to vector<16x128xf32>
    %7 = arith.maximumf %5, %6 : vector<16x128xf32>
    %8 = arith.truncf %7 : vector<16x128xf32> to vector<16x128xbf16>
    %c0_6 = arith.constant 0 : index
    %c0_7 = arith.constant 0 : index
    %9 = vector.load %arg4[%c0_6, %c0_7] : memref<128x128xbf16, #tpu.memory_space<vmem>>, vector<128x128xbf16>
    %cst_8 = arith.constant dense<0.000000e+00> : vector<16x128xf32>
    %10 = tpu.matmul %8, %9, %cst_8 {dimension_numbers = #tpu.dot_dimension_numbers<[1], [0], [0], [1], [0, 0, 1, 1], [], []>} : vector<16x128xbf16>, vector<128x128xbf16>, vector<16x128xf32> -> vector<16x128xf32>
    %c0_9 = arith.constant 0 : index
    %c0_10 = arith.constant 0 : index
    %11 = vector.load %arg5[%c0_9, %c0_10] : memref<1x128xf32, #tpu.memory_space<vmem>>, vector<1x128xf32>
    %12 = vector.broadcast %11 : vector<1x128xf32> to vector<16x128xf32>
    %13 = arith.addf %10, %12 : vector<16x128xf32>
    %c0_11 = arith.constant 0 : index
    %c0_12 = arith.constant 0 : index
    %14 = vector.load %arg6[%c0_11, %c0_12] : memref<16x128xf32, #tpu.memory_space<vmem>>, vector<16x128xf32>
    tpu.vector_store %arg6[%c0_11, %c0_12], %13 {strides = array<i32>} : memref<16x128xf32, #tpu.memory_space<vmem>>, vector<16x128xf32>,
    return
  }
  func.func @transform_0(%arg0: i32) -> (i32, i32) {
    %c0_i32 = arith.constant 0 : i32
    %c0_i32_0 = arith.constant 0 : i32
    return %arg0, %c0_i32 : i32, i32
  }
  func.func @transform_1(%arg0: i32) -> (i32, i32) {
    %c0_i32 = arith.constant 0 : i32
    %c0_i32_0 = arith.constant 0 : i32
    %c0_i32_1 = arith.constant 0 : i32
    return %c0_i32, %c0_i32_0 : i32, i32
  }
  func.func @transform_2(%arg0: i32) -> (i32, i32) {
    %c0_i32 = arith.constant 0 : i32
    %c0_i32_0 = arith.constant 0 : i32
    %c0_i32_1 = arith.constant 0 : i32
    return %c0_i32, %c0_i32_0 : i32, i32
  }
  func.func @transform_3(%arg0: i32) -> (i32, i32) {
    %c0_i32 = arith.constant 0 : i32
    %c0_i32_0 = arith.constant 0 : i32
    %c0_i32_1 = arith.constant 0 : i32
    return %c0_i32, %c0_i32_0 : i32, i32
  }
  func.func @transform_4(%arg0: i32) -> (i32, i32) {
    %c0_i32 = arith.constant 0 : i32
    %c0_i32_0 = arith.constant 0 : i32
    %c0_i32_1 = arith.constant 0 : i32
    return %c0_i32, %c0_i32_0 : i32, i32
  }
  func.func @transform_5(%arg0: i32) -> (i32, i32) {
    %c0_i32 = arith.constant 0 : i32
    %c0_i32_0 = arith.constant 0 : i32
    return %arg0, %c0_i32 : i32, i32
  }
}

</mosaic_0001>

<bundles_post_ra>
// kernel: _logits.1
= control target key start
LH: loop header
LB: loop body
LE: loop exit
PB: predicated region body
PF: predicated region fallthrough
CT: control target
= control target key end

     0   :  { %10 = vsyncpa [#allocation3], 0  ;;  %s400_s18 = smov [#allocation2]   ;;  %s486_s0 = inlined_call_operand.vmem [shape: bf16[16,128], index: 0, kind: input, shape index: {}]   ;;  %s487_s1 = inlined_call_operand.hbm [shape: bf16[128,128], index: 1, kind: input, shape index: {}]   ;;  %s488_s2 = inlined_call_operand.vmem [shape: f32[1,128], index: 2, kind: input, shape index: {}, may-alias: {2,4}]   ;;  %s489_s3 = inlined_call_operand.vmem [shape: bf16[128,128], index: 3, kind: input, shape index: {}]   ;;  %s490_s4 = inlined_call_operand.vmem [shape: f32[1,128], index: 4, kind: input, shape index: {}, may-alias: {2,4}]   ;;  %s491_s5 = inlined_call_operand.vmem [shape: f32[16,128], index: 5, kind: output, shape index: {}]  }
   0x1   :  { %s18_s19 = sshll.u32 %s400_s18, 4  ;;  %s376_s22 = scalar_lea.hbm %s487_s1, 1024  ;;  %s19_s19 = int_to_ptr.vmem [resolvable:$true] %s18_s19 }
   0x2   :  { %p377_p0 = scmp.ne.s32.totalorder %s487_s1, %s376_s22  ;;  %p380_p1 = scmp.lt.u32.totalorder %s376_s22, %s487_s1 }
   0x4   :  { %p382_p2 = pnand %p380_p1, %p377_p0 }
   0x6   :  { %385 = shalt.err (!%p382_p2)
}
   0x7   :  { %s386_s27 = scalar_lea.vmem %s19_s19, 1024  ;;  %p391_p4 = scmp.lt.s32.totalorder %s19_s19, %s19_s19 }
   0x8   :  { %p387_p3 = scmp.ne.s32.totalorder %s19_s19, %s386_s27  ;;  %p392_p5 = scmp.lt.s32.totalorder %s386_s27, %s386_s27 }
   0xa   :  { %p393_p6 = por %p392_p5, %p391_p4 }
   0xc   :  { %p394_p7 = pnand %p393_p6, %p387_p3 }
   0xe   :  { %397 = shalt.err (!%p394_p7)
}
   0xf   :  { %s401_s28 = smov 64   ;;  %s402_s29 = smov 4  }
  0x10   :  { %24 = dma.hbm_to_vmem [thread:$0]  %s487_s1, 1024, %s19_s19, [#allocation3], %s401_s28, %s401_s28, %s402_s29  }
  0x11   :  { %398 = dma.done.wait [#allocation3], 1024  }
  0x12   :  { %399 = vsyncadd [#allocation3], 4294966272  ;;  %v403_v0 = vmov 0.0   ;;  %vm404_vm0 = vmmov 0   ;;  %v359_v1 = vld [vmem:[#allocation2] sm:$0xff]   ;;  %v360_v2 = vld [vmem:[#allocation2 + $0x8] sm:$0xff]  }
  0x13   :  { %314 = vmatprep.subr.bf16.mxu0 %v403_v0  ;;  %330 = vmatprep.mubr.msk.bf16.mxu0 %vm404_vm0, %v403_v0  ;;  %v361_v3 = vld [vmem:[#allocation2 + $0x10] sm:$0xff]   ;;  %v368_v4 = vld [vmem:[%s489_s3] sm:$0xff]   ;;  %v362_v5 = vld [vmem:[#allocation2 + $0x18] sm:$0xff]  }
  0x14   :  { %334 = vmatprep.subr.bf16.mxu1 %v403_v0  ;;  %350 = vmatprep.mubr.msk.bf16.mxu1 %vm404_vm0, %v403_v0  ;;  %v369_v6 = vld [vmem:[%s489_s3 + $0x8] sm:$0xff]   ;;  %v363_v7 = vld [vmem:[#allocation2 + $0x20] sm:$0xff]   ;;  %v370_v8 = vld [vmem:[%s489_s3 + $0x10] sm:$0xff]  }
  0x15   :  { %315 = vmatpush3.bf16.msra.mxu0 %v359_v1  ;;  %335 = vmatpush3.bf16.msra.mxu1 %v368_v4  ;;  %v364_v9 = vld [vmem:[#allocation2 + $0x28] sm:$0xff]   ;;  %v371_v10 = vld [vmem:[%s489_s3 + $0x18] sm:$0xff]   ;;  %v365_v11 = vld [vmem:[#allocation2 + $0x30] sm:$0xff]  }
  0x16   :  { %316 = vmatprep.subr.bf16.mxu0 %v403_v0  ;;  %336 = vmatprep.subr.bf16.mxu1 %v403_v0  ;;  %v372_v12 = vld [vmem:[%s489_s3 + $0x20] sm:$0xff]   ;;  %v366_v13 = vld [vmem:[#allocation2 + $0x38] sm:$0xff]   ;;  %v373_v14 = vld [vmem:[%s489_s3 + $0x28] sm:$0xff]  }
  0x17   :  { %v367_v15 = vld [vmem:[%s486_s0] sm:$0xff]   ;;  %v374_v16 = vld [vmem:[%s489_s3 + $0x30] sm:$0xff]   ;;  %v375_v17 = vld [vmem:[%s489_s3 + $0x38] sm:$0xff]  }
  0x18   :  { %v277_v18 = vld [vmem:[%s488_s2] ss:$0 sm:$0xff] }
  0x19   :  { %317 = vmatpush3.bf16.msra.mxu0 %v360_v2  ;;  %337 = vmatpush3.bf16.msra.mxu1 %v369_v6  ;;  %v287_v28 = vld [vmem:[%s490_s4] ss:$0 sm:$0xff] }
  0x1a   :  { %318 = vmatprep.subr.bf16.mxu0 %v403_v0  ;;  %338 = vmatprep.subr.bf16.mxu1 %v403_v0 }
  0x1d   :  { %319 = vmatpush3.bf16.msra.mxu0 %v361_v3  ;;  %339 = vmatpush3.bf16.msra.mxu1 %v370_v8 }
  0x1e   :  { %320 = vmatprep.subr.bf16.mxu0 %v403_v0  ;;  %340 = vmatprep.subr.bf16.mxu1 %v403_v0 }
  0x21   :  { %321 = vmatpush3.bf16.msra.mxu0 %v362_v5  ;;  %341 = vmatpush3.bf16.msra.mxu1 %v371_v10 }
  0x22   :  { %322 = vmatprep.subr.bf16.mxu0 %v403_v0  ;;  %342 = vmatprep.subr.bf16.mxu1 %v403_v0 }
  0x25   :  { %323 = vmatpush3.bf16.msra.mxu0 %v363_v7  ;;  %343 = vmatpush3.bf16.msra.mxu1 %v372_v12 }
  0x26   :  { %324 = vmatprep.subr.bf16.mxu0 %v403_v0  ;;  %344 = vmatprep.subr.bf16.mxu1 %v403_v0 }
  0x29   :  { %325 = vmatpush3.bf16.msra.mxu0 %v364_v9  ;;  %345 = vmatpush3.bf16.msra.mxu1 %v373_v14 }
  0x2a   :  { %326 = vmatprep.subr.bf16.mxu0 %v403_v0  ;;  %346 = vmatprep.subr.bf16.mxu1 %v403_v0 }
  0x2d   :  { %327 = vmatpush3.bf16.msra.mxu0 %v365_v11  ;;  %347 = vmatpush3.bf16.msra.mxu1 %v374_v16 }
  0x2e   :  { %328 = vmatprep.subr.bf16.mxu0 %v403_v0  ;;  %348 = vmatprep.subr.bf16.mxu1 %v403_v0 }
  0x31   :  { %329 = vmatpush3.bf16.msra.mxu0 %v366_v13  ;;  %349 = vmatpush3.bf16.msra.mxu1 %v375_v17 }
  0x34   :  { %331 = vmatmul.mubr.bf16.vlgmr.msra.gmra.mrb[0].mxu0 %v367_v15 }
 0x107   :  { %v148_v19 = vpop.f32.mrb[0].mxu0 }
 0x108   :  { %v149_v20 = vadd.f32 %v277_v18, %v148_v19  ;;  %v332_v21 = vpop.f32.mrb[1].mxu0 }
 0x109   :  { %v151_v22 = vpop.f32.mrb[2].mxu0 }
 0x10a   :  { %v152_v23 = vadd.f32 %v277_v18, %v151_v22  ;;  %v333_v24 = vpop.f32.mrb[3].mxu0  ;;  %v155_v25 = vmax.f32 %v149_v20, 0.0 }
 0x10c   :  { %v156_v26 = vmax.f32 %v152_v23, 0.0 }
 0x10e   :  { %v157_v27 = vpack.c.bf16 %v156_v26, %v155_v25 }
 0x110   :  { %351 = vmatmul.mubr.bf16.vlgmr.msra.gmra.mrb[0].mxu1 %v157_v27 }
 0x1e3   :  { %v263_v29 = vpop.f32.mrb[0].mxu1 }
 0x1e4   :  { %v264_v30 = vadd.f32 %v287_v28, %v263_v29  ;;  %v352_v31 = vpop.f32.mrb[1].mxu1 }
 0x1e5   :  { %v266_v32 = vpop.f32.mrb[2].mxu1 }
 0x1e6   :  { %270 = vst [vmem:[%s491_s5] sm:$0xff] %v264_v30  ;;  %v267_v33 = vadd.f32 %v287_v28, %v266_v32  ;;  %v353_v34 = vpop.f32.mrb[3].mxu1 }
 0x1e8   :  { %271 = vst [vmem:[%s491_s5 + $0x8] sm:$0xff] %v267_v33 }
 0x1e9   :  { %276 = vsyncpa [#allocation3], 1 }

</bundles_post_ra>
